<compile_context>
chip_gen: v6e
topology: v6e:2x2x1
jax: 0.10.0
libtpu: 0.0.40
codegen_flags: <defaults>
</compile_context>

<pallas_src>
import jax
import jax.numpy as jnp
import numpy as np
from jax import lax
from jax.experimental import pallas as pl
from jax.experimental.pallas import tpu as pltpu


def _round_up(x, m):
    return ((x + m - 1) // m) * m


def _nconv_kernel(x_ref, at_ref, o_ref):
    # x_ref : (Bnc, V, L)  -- native x layout: V on sublanes, L on lanes
    # at_ref: (W, V)       -- A^T, resident in VMEM (constant block index)
    # o_ref : (Bnc, W, L)  -- native output layout; no epilogue transpose
    bnc = x_ref.shape[0]

    def body(b, carry):
        # (W, V) @ (V, L) on the MXU, f32 accumulation, one (n, c) plane.
        o_ref[b] = jnp.dot(
            at_ref[...], x_ref[b], preferred_element_type=jnp.float32
        ).astype(o_ref.dtype)
        return carry

    lax.fori_loop(0, bnc, body, 0, unroll=bnc <= 8)


def _choose_block_nc(nc, v, l, w, x_itemsize, out_itemsize):
    """(n*c) rows per grid step, sized from an explicit VMEM budget."""
    lanes = _round_up(l, 128)
    x_sub = max(8, 32 // x_itemsize)       # sublane tile: 8 (f32) / 16 (bf16)
    o_sub = max(8, 32 // out_itemsize)
    x_row = _round_up(v, x_sub) * lanes * x_itemsize
    o_row = _round_up(w, o_sub) * lanes * out_itemsize
    per_row = 2 * (x_row + o_row)          # x2: Pallas double-buffers blocks
    budget = 16 * 1024 * 1024              # headroom under the 32 MiB limit
    bnc = max(1, budget // per_row)
    # v7x: keep at least 4 grid steps (when NC allows) so the "parallel"
    # grid axis actually shards across both TensorCores.
    bnc = min(bnc, max(1, pl.cdiv(nc, 4)))
    return int(min(bnc, nc))


def nconv(x, A, *, block_nc=None, compute_dtype=None):
    """Pallas implementation of torch.einsum('ncvl,vw->ncwl', x, A)."""
    N, C, V, L = x.shape
    V2, W = A.shape
    assert V == V2, "contraction dim mismatch"

    out_dtype = x.dtype
    if compute_dtype is not None:
        # Optional bf16 streaming path (v6e/v7x): halves dominant HBM read
        # traffic; the MXU multiplies bf16, accumulation stays f32 in-kernel.
        x = x.astype(compute_dtype)
        A = A.astype(compute_dtype)

    NC = N * C
    x3 = x.reshape(NC, V, L)   # free reshape: merges contiguous leading dims
    At = jnp.transpose(A)      # (W, V): tiny one-time relayout, VMEM-resident

    if block_nc is None:
        block_nc = _choose_block_nc(
            NC, V, L, W,
            jnp.dtype(x.dtype).itemsize,
            jnp.dtype(out_dtype).itemsize,
        )
    Bnc = int(min(block_nc, NC))

    grid = (pl.cdiv(NC, Bnc),)   # ragged last block handled by Pallas

    out3 = pl.pallas_call(
        _nconv_kernel,
        out_shape=jax.ShapeDtypeStruct((NC, W, L), out_dtype),
        grid_spec=pltpu.PrefetchScalarGridSpec(
            num_scalar_prefetch=0,
            grid=grid,
            in_specs=[
                # Streamed operand: one (Bnc, V, L) slab per step.  (If xprof
                # ever shows exposed DMA after this sizing, add
                # pipeline_mode=pl.Buffered(3) here; otherwise spend the VMEM
                # on a larger Bnc instead.)
                pl.BlockSpec((Bnc, V, L), lambda i: (i, 0, 0)),
                # A^T: constant block index -> fetched once, stays in VMEM.
                pl.BlockSpec((W, V), lambda i: (0, 0)),
            ],
            out_specs=pl.BlockSpec((Bnc, W, L), lambda i: (i, 0, 0)),
        ),
        compiler_params=pltpu.CompilerParams(
            # Single parallel axis: Bnc-slabs shard across both TensorCores
            # on v7x; no-op on v5e/v6e.
            dimension_semantics=("parallel",),
            # Explicit scoped-VMEM limit: v5e's default is 16 MiB (v6e/v7x:
            # 32 MiB).  The block budget above targets ~16 MiB, so 32 MiB is
            # safe on every generation (v7x physical VMEM/TC is 64 MiB).
            vmem_limit_bytes=32 * 1024 * 1024,
        ),
    )(x3, At)

    # Free reshape; data is already in (n, c, w, l) order.
    return out3.reshape(N, C, W, L)


if __name__ == "__main__":
    key = jax.random.PRNGKey(0)
    kx, ka, kx2, ka2 = jax.random.split(key, 4)

    # Small shapes consistent with the module: x (N, C, V, L), A (V, W).
    N, C, V, L, W = 2, 4, 16, 16, 16
    x = jax.random.normal(kx, (N, C, V, L), dtype=jnp.float32)
    A = jax.random.normal(ka, (V, W), dtype=jnp.float32)

    out = jax.block_until_ready(nconv(x, A))
    ref = jnp.einsum("ncvl,vw->ncwl", x, A)
    np.testing.assert_allclose(np.asarray(out), np.asarray(ref),
                               rtol=1e-5, atol=1e-5)

    # Awkward (non-8/128) dims, W != V, and a ragged last block (NC=5, Bnc=2).
    N2, C2, V2_, L2, W2 = 1, 5, 20, 13, 24
    xb = jax.random.normal(kx2, (N2, C2, V2_, L2), dtype=jnp.float32)
    Ab = jax.random.normal(ka2, (V2_, W2), dtype=jnp.float32)

    outb = jax.block_until_ready(nconv(xb, Ab))
    refb = jnp.einsum("ncvl,vw->ncwl", xb, Ab)
    np.testing.assert_allclose(np.asarray(outb), np.asarray(refb),
                               rtol=1e-5, atol=1e-5)

    # Optional bf16 streaming path (f32 accumulation); compare against a
    # reference computed on bf16-rounded inputs.
    outc = jax.block_until_ready(nconv(x, A, compute_dtype=jnp.bfloat16))
    refc = jnp.einsum(
        "ncvl,vw->ncwl",
        x.astype(jnp.bfloat16).astype(jnp.float32),
        A.astype(jnp.bfloat16).astype(jnp.float32),
    )
    np.testing.assert_allclose(np.asarray(outc), np.asarray(refc),
                               rtol=5e-3, atol=5e-3)

    print("KERNEL_OK")
</pallas_src>

<mosaic_0001>
module attributes {stable_mosaic.version = 11 : i64} {
  func.func @_nconv_kernel(%arg0: i32, %arg1: memref<2x16x16xf32, #tpu.memory_space<vmem>>, %arg2: memref<16x16xf32, #tpu.memory_space<vmem>>, %arg3: memref<2x16x16xf32, #tpu.memory_space<vmem>>) attributes {dimension_semantics = [#tpu.dimension_semantics<parallel>], iteration_bounds = array<i64: 4>, scalar_prefetch = 0 : i64, scratch_operands = 0 : i64, tpu.core_type = #tpu.core_type<tc>, window_params = [{transform_indices = @transform_0, window_bounds = array<i64: 2, 16, 16>}, {pipeline_mode = #tpu.pipeline_mode<synchronous>, transform_indices = @transform_1, window_bounds = array<i64: 16, 16>}, {transform_indices = @transform_2, window_bounds = array<i64: 2, 16, 16>}]} {
    %c0_i32 = arith.constant 0 : i32
    %c0 = arith.constant 0 : index
    %c0_0 = arith.constant 0 : index
    %0 = vector.load %arg2[%c0, %c0_0] : memref<16x16xf32, #tpu.memory_space<vmem>>, vector<16x16xf32>
    %1 = arith.index_cast %c0_i32 : i32 to index
    %c0_1 = arith.constant 0 : index
    %c0_2 = arith.constant 0 : index
    %2 = vector.load %arg1[%1, %c0_1, %c0_2] : memref<2x16x16xf32, #tpu.memory_space<vmem>>, vector<1x16x16xf32>
    %3 = vector.shape_cast %2 : vector<1x16x16xf32> to vector<16x16xf32>
    %cst = arith.constant dense<0.000000e+00> : vector<16x16xf32>
    %4 = tpu.matmul %0, %3, %cst {dimension_numbers = #tpu.dot_dimension_numbers<[1], [0], [0], [1], [0, 0, 1, 1], [], []>} : vector<16x16xf32>, vector<16x16xf32>, vector<16x16xf32> -> vector<16x16xf32>
    %5 = arith.index_cast %c0_i32 : i32 to index
    %c0_3 = arith.constant 0 : index
    %c0_4 = arith.constant 0 : index
    %6 = vector.load %arg3[%5, %c0_3, %c0_4] : memref<2x16x16xf32, #tpu.memory_space<vmem>>, vector<1x16x16xf32>
    %7 = vector.shape_cast %6 : vector<1x16x16xf32> to vector<16x16xf32>
    %8 = vector.shape_cast %4 : vector<16x16xf32> to vector<1x16x16xf32>
    tpu.vector_store %arg3[%5, %c0_3, %c0_4], %8 {strides = array<i32>} : memref<2x16x16xf32, #tpu.memory_space<vmem>>, vector<1x16x16xf32>,
    %c1_i32 = arith.constant 1 : i32
    %c0_5 = arith.constant 0 : index
    %c0_6 = arith.constant 0 : index
    %9 = vector.load %arg2[%c0_5, %c0_6] : memref<16x16xf32, #tpu.memory_space<vmem>>, vector<16x16xf32>
    %10 = arith.index_cast %c1_i32 : i32 to index
    %c0_7 = arith.constant 0 : index
    %c0_8 = arith.constant 0 : index
    %11 = vector.load %arg1[%10, %c0_7, %c0_8] : memref<2x16x16xf32, #tpu.memory_space<vmem>>, vector<1x16x16xf32>
    %12 = vector.shape_cast %11 : vector<1x16x16xf32> to vector<16x16xf32>
    %cst_9 = arith.constant dense<0.000000e+00> : vector<16x16xf32>
    %13 = tpu.matmul %9, %12, %cst_9 {dimension_numbers = #tpu.dot_dimension_numbers<[1], [0], [0], [1], [0, 0, 1, 1], [], []>} : vector<16x16xf32>, vector<16x16xf32>, vector<16x16xf32> -> vector<16x16xf32>
    %14 = arith.index_cast %c1_i32 : i32 to index
    %c0_10 = arith.constant 0 : index
    %c0_11 = arith.constant 0 : index
    %15 = vector.load %arg3[%14, %c0_10, %c0_11] : memref<2x16x16xf32, #tpu.memory_space<vmem>>, vector<1x16x16xf32>
    %16 = vector.shape_cast %15 : vector<1x16x16xf32> to vector<16x16xf32>
    %17 = vector.shape_cast %13 : vector<16x16xf32> to vector<1x16x16xf32>
    tpu.vector_store %arg3[%14, %c0_10, %c0_11], %17 {strides = array<i32>} : memref<2x16x16xf32, #tpu.memory_space<vmem>>, vector<1x16x16xf32>,
    %c2_i32 = arith.constant 2 : i32
    return
  }
  func.func @transform_0(%arg0: i32) -> (i32, i32, i32) {
    %c0_i32 = arith.constant 0 : i32
    %c0_i32_0 = arith.constant 0 : i32
    %c0_i32_1 = arith.constant 0 : i32
    return %arg0, %c0_i32, %c0_i32_0 : i32, i32, i32
  }
  func.func @transform_1(%arg0: i32) -> (i32, i32) {
    %c0_i32 = arith.constant 0 : i32
    %c0_i32_0 = arith.constant 0 : i32
    %c0_i32_1 = arith.constant 0 : i32
    return %c0_i32, %c0_i32_0 : i32, i32
  }
  func.func @transform_2(%arg0: i32) -> (i32, i32, i32) {
    %c0_i32 = arith.constant 0 : i32
    %c0_i32_0 = arith.constant 0 : i32
    %c0_i32_1 = arith.constant 0 : i32
    return %arg0, %c0_i32, %c0_i32_0 : i32, i32, i32
  }
}

</mosaic_0001>

<bundles_post_ra>
// kernel: tpu_custom_call.1
= control target key start
LH: loop header
LB: loop body
LE: loop exit
PB: predicated region body
PF: predicated region fallthrough
CT: control target
= control target key end

     0   :  { %7 = vsyncpa [#allocation3], 0  ;;  %s903_s0 = inlined_call_operand.hbm [shape: f32[8,16,16], index: 0, kind: input, shape index: {}]   ;;  %s904_s1 = inlined_call_operand.hbm [shape: f32[16,16], index: 1, kind: input, shape index: {}]   ;;  %s905_s2 = inlined_call_operand.hbm [shape: f32[8,16,16], index: 2, kind: output, shape index: {}]  }
   0x1   :  { %9 = vsyncpa [#allocation3 + $0x1], 0 }
   0x2   :  { %10 = vsyncpa [#allocation6], 0 }
   0x3   :  { %11 = vsyncpa [#allocation4], 0 }
   0x4   :  { %13 = vsyncpa [#allocation4 + $0x1], 0  ;;  %s714_s9 = smov 0   ;;  %s716_s10 = smov 0  }
   0x5   :  { %s718_s11 = smov 0   ;;  %s720_s12 = smov 0  }
   0x6 LB: > { %s735_s13 = sadd.s32 4294967295, %s690_s12   ;;  %s455_s14 = sadd.s32 4294967294, %s690_s12   ;;  %s690_s12 = sphi %s720_s12, %s926_s12   ;;  %s686_s11 = sphi %s718_s11, %s925_s11   ;;  %s682_s10 = sphi %s716_s10, %s924_s10   ;;  %s678_s9 = sphi %s714_s9, %s923_s9  }
   0x7   : > { %p39_p0 = scmp.ne.s32.totalorder %s682_s10, %s678_s9  ;;  %p906_p1 = scmp.eq.s32.totalorder %s735_s13, 0 }
   0x8   : > { %p90_p3 = scmp.eq.s32.totalorder %s455_s14, 3  ;;  %p456_p5 = scmp.ge.s32.totalorder %s690_s12, 1 }
   0x9   : > { %p744_p4 = por %p906_p1, %p39_p0  ;;  %p97_p7 = scmp.lt.s32.totalorder %s690_s12, 5 }
   0xa   : > { %p749_p6 = por %p90_p3, %p39_p0  ;;  %s692_s18 = smov [#allocation5]  }
   0xb   : > { %s910_s15 = scalar_select %p744_p4, 1, 0 }
   0xc   : > { %s911_s16 = scalar_select %p749_p6, 1, 0 }
   0xd   : > { %p754_p8 = pnand %p456_p5, %p97_p7  ;;  %s109_s19 = sshll.u32 %s692_s18, 4  ;;  %s110_s19 = int_to_ptr.vmem [resolvable:$true] %s109_s19 }
   0xe   : > { %s767_s21 = sadd.s32 1, %s690_s12   ;;  %s26_s22 = sadd.s32 1, %s686_s11 }
   0xf   : > { %s912_s17 = scalar_select %p754_p8, 1, 0 }
  0x10   : > { %p515_p9 = pneg %p754_p8  ;;  %s23_s23 = ssub.s32 %s690_s12, %s767_s21 }
  0x11   : > { %s579_s24 = scalar_lea.vmem %s110_s19, 256  ;;  %p587_p3 = scmp.lt.s32.totalorder %s110_s19, %s110_s19 }
  0x12   : > { %p762_p10 = pnand %p515_p9, %p906_p1  ;;  %p580_p12 = scmp.ne.s32.totalorder %s110_s19, %s579_s24 }
  0x13   : > { %p588_p5 = scmp.lt.s32.totalorder %s579_s24, %s579_s24 }
  0x14   : > { %p570_p11 = pneg %p762_p10 }
  0x15   : > { %p589_p7 = por %p588_p5, %p587_p3 }
  0x16   : > { %p582_p13 = pnand %p580_p12, %p570_p11 }
  0x18   : > { %p583_p0 = pneg %p582_p13 }
  0x1a   : > { %p590_p2 = pnand %p589_p7, %p583_p0 }
  0x1c   : > { %593 = shalt.err (!%p590_p2)
}
  0x1d   : > { %s693_s25 = smov 128   ;;  %s694_s26 = smov 8  }
  0x1e   : > { %518 = dma.hbm_to_vmem [thread:$0]  (!%p762_p10), %s904_s1, 256, %s110_s19, [#allocation6], %s693_s25, %s693_s25, %s694_s26  }
  0x1f   : > { %p24_p2 = scmp.eq.s32.totalorder %s23_s23, 0  ;;  %p33_p9 = scmp.ne.s32.totalorder %s686_s11, %s682_s10 }
  0x20   : > { %p34_p11 = scmp.eq.s32.totalorder %s690_s12, 0  ;;  %p528_p12 = scmp.lt.s32.totalorder %s690_s12, 4 }
  0x21   : > { %s787_s29 = scalar_select %p24_p2, %s686_s11, %s26_s22  }
  0x22   : > { %p35_p13 = por %p34_p11, %p33_p9  ;;  %p914_p0 = scmp.eq.s32.totalorder %s735_s13, 3 }
  0x23   : > { %s123_s3 = sand.u32 1, %s686_s11   ;;  %s482_s4 = sshll.u32 %s690_s12, 9 }
  0x24   : > { %p791_p3 = por %p914_p0, %p33_p9  ;;  %s459_s5 = sshll.u32 %s123_s3, 5 }
  0x25   : > { %s800_s8 = scalar_lea.hbm %s903_s0, %s482_s4  ;;  %s127_s14 = scalar_lea.vmem [#allocation2], %s459_s5 }
  0x26   : > { %s915_s30 = scalar_select %p791_p3, 1, 0 }
  0x27   : > { %s135_s18 = sshll.u32 %s127_s14, 4  ;;  %p802_p10 = pnand %p528_p12, %p35_p13  ;;  %s806_s18 = int_to_ptr.vmem [resolvable:$true] %s135_s18 }
  0x28   : > { %s808_s20 = scalar_lea.sflag [#allocation3], %s123_s3  ;;  %s594_s22 = scalar_lea.hbm %s800_s8, 512 }
  0x29   : > { %p595_p5 = scmp.ne.s32.totalorder %s800_s8, %s594_s22  ;;  %p596_p7 = pneg %p802_p10 }
  0x2a   : > { %s599_s27 = scalar_lea.hbm %s903_s0, 2048  ;;  %p600_p11 = scmp.lt.s32.totalorder %s800_s8, %s903_s0 }
  0x2b   : > { %p597_p2 = pnand %p596_p7, %p595_p5  ;;  %p601_p12 = scmp.lt.s32.totalorder %s599_s27, %s594_s22 }
  0x2d   : > { %p598_p9 = pneg %p597_p2  ;;  %p602_p13 = por %p601_p12, %p600_p11 }
  0x2f   : > { %p603_p0 = pnand %p602_p13, %p598_p9 }
  0x31   : > { %606 = shalt.err (!%p603_p0)
}
  0x32   : > { %s607_s3 = scalar_lea.vmem %s806_s18, 512  ;;  %s695_s5 = smov [#allocation2]  }
  0x33   : > { %p608_p1 = scmp.ne.s32.totalorder %s806_s18, %s607_s3  ;;  %s612_s6 = sshll.u32 %s695_s5, 4  ;;  %s613_s6 = int_to_ptr.vmem [resolvable:$false] %s612_s6 }
  0x34   : > { %s614_s7 = scalar_lea.vmem %s613_s6, 1024  ;;  %p615_p2 = scmp.lt.s32.totalorder %s806_s18, %s613_s6 }
  0x35   : > { %p610_p6 = pnand %p608_p1, %p596_p7  ;;  %p616_p3 = scmp.lt.s32.totalorder %s614_s7, %s607_s3 }
  0x37   : > { %p611_p5 = pneg %p610_p6  ;;  %p617_p4 = por %p616_p3, %p615_p2 }
  0x39   : > { %p618_p8 = pnand %p617_p4, %p611_p5 }
  0x3b   : > { %621 = shalt.err (!%p618_p8)
}
  0x3c   : > { %522 = dma.hbm_to_vmem [thread:$0]  (!%p802_p10), %s800_s8, 512, %s806_s18, %s808_s20, %s693_s25, %s693_s25, %s694_s26  }
  0x3d   : > { %p917_p1 = scmp.ne.s32.totalorder %s912_s17, 0 }
  0x3e   : > { %s835_s14 = sand.u32 (!%p917_p1), 1, %s682_s10   ;;  %p918_p4 = scmp.ne.s32.totalorder (!%p917_p1), %s910_s15, 0 }
  0x3f   : > { %147 = sbr.rel (%p917_p1) target bundleno = 287 (0x11f), region = 28  ;;  %s464_s22 = sshll.u32 (!%p917_p1), %s835_s14, 5 }
  0x40   : > { %s150_s23 = scalar_lea.sflag (!%p917_p1), [#allocation3], %s835_s14  ;;  %s153_s24 = scalar_lea.vmem (!%p917_p1), [#allocation2], %s464_s22 }
  0x44   : > { %665 = dma.done.wait (%p918_p4), %s150_s23, 512  }
  0x45   : > { %667 = vsyncadd (%p918_p4), %s150_s23, 4294966784  ;;  %p919_p6 = scmp.eq.s32.totalorder %s735_s13, 0 }
  0x47   : > { %669 = dma.done.wait (%p919_p6), [#allocation6], 256   ;;  %p920_p8 = pmov %p919_p6 }
  0x48   : > { %v183_v0 = vld [vmem:[%s153_s24 + $0x8] sm:$0xff]  ;;  %v470_v1 = vld [vmem:[%s153_s24 + $0x18] sm:$0xff]  ;;  %v182_v2 = vld [vmem:[%s153_s24] sm:$0xff]  ;;  %vm184_vm0 = vcmask 130048   ;;  %s177_s15 = scalar_lea.vmem [#allocation7], %s464_s22  ;;  %s484_s25 = sshll.u32 %s735_s13, 9 }
  0x49   : > { %671 = vsyncadd (%p920_p8), [#allocation6], 4294967040  ;;  %493 = vmatprep.subr.mxu0 %v183_v0  ;;  %500 = vmatprep.subr.mxu1 %v470_v1  ;;  %v469_v3 = vld [vmem:[%s153_s24 + $0x10] sm:$0xff]  ;;  %v180_v4 = vld [vmem:[#allocation5] sm:$0xff]  ;;  %s372_s17 = sshll.u32 %s177_s15, 4  ;;  %s857_s18 = scalar_lea.hbm %s905_s2, %s484_s25  ;;  %s852_s17 = int_to_ptr.vmem [resolvable:$true] %s372_s17 }
  0x4a   : > { %494 = vmatpush3.msra.mxu0 %v183_v0  ;;  %501 = vmatpush3.msra.mxu1 %v470_v1  ;;  %v181_v5 = vld [vmem:[#allocation5 + $0x8] sm:$0xff]  ;;  %s358_s13 = scalar_lea.sflag [#allocation4], %s835_s14  ;;  %s622_s19 = scalar_lea.vmem %s852_s17, 512 }
  0x4b   : > { %495 = vmatprep.subr.mxu0 %v182_v2  ;;  %502 = vmatprep.subr.mxu1 %v469_v3  ;;  %p623_p3 = scmp.ne.s32.totalorder %s852_s17, %s622_s19  ;;  %p921_p10 = scmp.ne.s32.totalorder %s915_s30, 0 }
  0x4c   : > { %496 = vmatpush3.msra.mxu0 %v182_v2  ;;  %497 = vmatprep.mubr.msk.f32.mxu0 %vm184_vm0, %v180_v4  ;;  %s696_s20 = smov [#allocation7]  }
  0x4d   : > { %503 = vmatpush3.msra.mxu1 %v469_v3  ;;  %504 = vmatprep.mubr.msk.f32.mxu1 %vm184_vm0, %v180_v4  ;;  %p624_p7 = pnand %p623_p3, %p921_p10  ;;  %s626_s27 = sshll.u32 %s696_s20, 4  ;;  %s627_s27 = int_to_ptr.vmem [resolvable:$false] %s626_s27 }
  0x4e   : > { %498 = vmatmul.mubr.msk.f32.vlgmr.msra.gmra.mxu0 %vm184_vm0, %v181_v5  ;;  %505 = vmatmul.mubr.msk.f32.vlgmr.msra.gmra.mxu1 %vm184_vm0, %v181_v5  ;;  %s628_s28 = scalar_lea.vmem %s627_s27, 1024  ;;  %p629_p11 = scmp.lt.s32.totalorder %s852_s17, %s627_s27 }
  0x4f   : > { %p625_p9 = pneg %p624_p7  ;;  %p630_p12 = scmp.lt.s32.totalorder %s628_s28, %s622_s19 }
  0x51   : > { %p631_p13 = por %p630_p12, %p629_p11 }
  0x53   : > { %p632_p0 = pnand %p631_p13, %p625_p9 }
 0x10e   : > { %v499_v6 = vpop.f32.mrf.mxu0  ;;  %v506_v7 = vpop.f32.mrf.mxu1 }
 0x10f   : > { %267 = vst.msk [vmem:[%s177_s15 + $0x8] sm:$0xff] %vm184_vm0, %v499_v6  ;;  %474 = vst.msk [vmem:[%s177_s15 + $0x18] sm:$0xff] %vm184_vm0, %v506_v7 }
 0x110   : > { %v257_v8 = vpop.f32.mrf.mxu0  ;;  %v345_v9 = vpop.f32.mrf.mxu1 }
 0x111   : > { %266 = vst.msk [vmem:[%s177_s15] sm:$0xff] %vm184_vm0, %v257_v8  ;;  %473 = vst.msk [vmem:[%s177_s15 + $0x10] sm:$0xff] %vm184_vm0, %v345_v9 }
 0x112   : > { %635 = shalt.err (!%p632_p0)
}
 0x113   : > { %s636_s4 = scalar_lea.hbm %s857_s18, 512  ;;  %s640_s6 = scalar_lea.hbm %s905_s2, 2048 }
 0x114   : > { %p637_p5 = scmp.ne.s32.totalorder %s857_s18, %s636_s4  ;;  %p641_p4 = scmp.lt.s32.totalorder %s857_s18, %s905_s2 }
 0x115   : > { %p642_p6 = scmp.lt.s32.totalorder %s640_s6, %s636_s4 }
 0x116   : > { %p638_p2 = pnand %p637_p5, %p921_p10 }
 0x117   : > { %p643_p8 = por %p642_p6, %p641_p4 }
 0x118   : > { %p639_p1 = pneg %p638_p2 }
 0x11a   : > { %p644_p3 = pnand %p643_p8, %p639_p1 }
 0x11c   : > { %647 = shalt.err (!%p644_p3)
}
 0x11d   : > { %s697_s23 = smov 128   ;;  %s698_s24 = smov 8  }
 0x11e   : > { %513 = dma.vmem_to_hbm [thread:$0]  (%p921_p10), %s852_s17, 512, %s857_s18, %s358_s13, %s697_s23, %s697_s23, %s698_s24  }
 0x11f PF: > { %p530_p7 = scmp.ge.s32.totalorder %s690_s12, 2  ;;  %s387_s15 = sand.u32 1, %s678_s9  }
 0x120   : > { %p922_p9 = scmp.ne.s32.totalorder %s911_s16, 0  ;;  %s388_s25 = scalar_lea.sflag [#allocation4], %s387_s15 }
 0x122   : > { %p524_p11 = pnand %p530_p7, %p922_p9 }
 0x124   : > { %p525_p12 = pneg %p524_p11 }
 0x126   : > { %673 = dma.done.wait (%p525_p12), %s388_s25, 512  }
 0x127   : > { %675 = vsyncadd (%p525_p12), %s388_s25, 4294966784  ;;  %p16_p13 = scmp.ge.s32.totalorder %s767_s21, 6   ;;  %s923_s9 = smov %s682_s10 }
 0x128   : > { %s924_s10 = smov %s686_s11  ;;  %s925_s11 = smov %s787_s29 }
 0x129   : > { %s926_s12 = smov %s767_s21  ;;  %18 = sbr.rel (!%p16_p13) target bundleno = 6 (0x6), region = 79 }
 0x12e   :  { %393 = vsyncpa [#allocation3], 1 }
 0x12f   :  { %395 = vsyncpa [#allocation3 + $0x1], 1 }
 0x130   :  { %396 = vsyncpa [#allocation6], 1 }
 0x131   :  { %397 = vsyncpa [#allocation4], 1 }
 0x132   :  { %399 = vsyncpa [#allocation4 + $0x1], 1 }

</bundles_post_ra>
